<compile_context>
chip_gen: v7x
topology: tpu7x:2x2x1
jax: 0.10.0
libtpu: 0.0.40
codegen_flags: <defaults>
</compile_context>

<pallas_src>
import jax
import jax.numpy as jnp
from jax.experimental import pallas as pl
from jax.experimental.pallas import tpu as pltpu


_LANES = 128            # lane width: full (8,128) vreg tiles, unmasked stores
_MAX_BLOCK_ROWS = 8192  # 8192 * 128 * 4 B = 4 MiB per block (v7x-safe)


def _ae_kernel(params_ref, x_ref, o_ref):
    # params_ref: SMEM (8,) f32 = [w1, b1, w2, b2, w3, b3, w4, b4]
    # x_ref / o_ref: VMEM (block_rows, 128) f32 tiles.
    v = x_ref[...]
    # encoder: Linear(1,1) -> Tanh -> Linear(1,1) -> Tanh
    v = jnp.tanh(v * params_ref[0] + params_ref[1])
    v = jnp.tanh(v * params_ref[2] + params_ref[3])
    # decoder: Linear(1,1) -> Tanh -> Linear(1,1) -> Tanh
    v = jnp.tanh(v * params_ref[4] + params_ref[5])
    v = jnp.tanh(v * params_ref[6] + params_ref[7])
    o_ref[...] = v


def _choose_block_rows(rows):
    """~Half the rows (>=2 blocks for megacore), sublane-aligned, <= 4 MiB."""
    half = pl.cdiv(rows, 2)
    half = ((half + 7) // 8) * 8            # round up to sublane multiple of 8
    block = min(_MAX_BLOCK_ROWS, half)
    block = min(block, rows)                # never exceed the array extent
    return max(block, 1)


def _run_slab(slab, params):
    """slab: (rows, 128) f32 -> same shape, 4x tanh(w*x+b) applied."""
    rows = slab.shape[0]
    block_rows = _choose_block_rows(rows)
    grid = (pl.cdiv(rows, block_rows),)
    return pl.pallas_call(
        _ae_kernel,
        out_shape=jax.ShapeDtypeStruct(slab.shape, slab.dtype),
        grid=grid,
        in_specs=[
            pl.BlockSpec(memory_space=pltpu.MemorySpace.SMEM),       # scalars
            pl.BlockSpec((block_rows, _LANES), lambda i: (i, 0)),    # row tiles
        ],
        out_specs=pl.BlockSpec((block_rows, _LANES), lambda i: (i, 0)),
        compiler_params=pltpu.CompilerParams(
            dimension_semantics=("parallel",),       # megacore row sharding
            vmem_limit_bytes=32 * 1024 * 1024,
        ),
    )(params, slab)


def _tanh_chain_jnp(v, params):
    for i in range(4):
        v = jnp.tanh(v * params[2 * i] + params[2 * i + 1])
    return v


def autoencoder_forward(x, params):
    """x: (N, 1) float32, params: (8,) float32 -> (N, 1) float32."""
    orig_shape = x.shape
    assert orig_shape[-1] == 1, "AutoEncoderModel expects feature dim of size 1"

    flat = x.reshape(-1).astype(jnp.float32)   # contiguous reshape: free
    n = flat.shape[0]

    bulk = (n // _LANES) * _LANES
    rem = n - bulk

    if rem == 0:
        # Aligned fast path: zero extra HBM passes (reshapes are metadata-only).
        out = _run_slab(flat.reshape(n // _LANES, _LANES), params)
        return out.reshape(orig_shape)

    # Ragged path: 128-aligned bulk through the kernel, <128-element tail
    # through a trivial jnp path (no full-array jnp.pad / output slice).
    pieces = []
    if bulk > 0:
        bulk_out = _run_slab(flat[:bulk].reshape(bulk // _LANES, _LANES), params)
        pieces.append(bulk_out.reshape(-1))
    pieces.append(_tanh_chain_jnp(flat[bulk:], params))
    return jnp.concatenate(pieces).reshape(orig_shape)


def reference_forward(x, params):
    return _tanh_chain_jnp(x.astype(jnp.float32), params)


if __name__ == "__main__":
    key = jax.random.PRNGKey(0)
    kx, kx2, kx3, kp = jax.random.split(key, 4)

    # Deterministic synthetic parameters: 4 layers x (weight, bias), all
    # scalars (nn.Linear(1,1) has a 1x1 weight and a 1-element bias).
    params = jax.random.uniform(kp, (8,), dtype=jnp.float32, minval=-1.0, maxval=1.0)

    # Small inputs consistent with the module: batches of scalars, shape (N, 1).
    x1 = jax.random.normal(kx, (4096, 1), dtype=jnp.float32)   # aligned, 2-block grid
    x2 = jax.random.normal(kx2, (1000, 1), dtype=jnp.float32)  # ragged: bulk + tail
    x3 = jax.random.normal(kx3, (96, 1), dtype=jnp.float32)    # tiny, jnp-only tail path

    y1 = jax.block_until_ready(autoencoder_forward(x1, params))
    y2 = jax.block_until_ready(autoencoder_forward(x2, params))
    y3 = jax.block_until_ready(autoencoder_forward(x3, params))

    y1_ref = reference_forward(x1, params)
    y2_ref = reference_forward(x2, params)
    y3_ref = reference_forward(x3, params)

    assert y1.shape == x1.shape and y2.shape == x2.shape and y3.shape == x3.shape
    assert jnp.allclose(y1, y1_ref, atol=1e-6, rtol=1e-6)
    assert jnp.allclose(y2, y2_ref, atol=1e-6, rtol=1e-6)
    assert jnp.allclose(y3, y3_ref, atol=1e-6, rtol=1e-6)

    print("KERNEL_OK")
</pallas_src>

<mosaic_0001>
module attributes {stable_mosaic.version = 11 : i64} {
  func.func @_ae_kernel(%arg0: i32, %arg1: memref<8xf32, #tpu.memory_space<smem>>, %arg2: memref<16x128xf32, #tpu.memory_space<vmem>>, %arg3: memref<16x128xf32, #tpu.memory_space<vmem>>) attributes {dimension_semantics = [#tpu.dimension_semantics<parallel>], iteration_bounds = array<i64: 2>, scalar_prefetch = 0 : i64, scratch_operands = 0 : i64, tpu.core_type = #tpu.core_type<tc>, window_params = [{transform_indices = @transform_0, window_bounds = array<i64: 8>}, {transform_indices = @transform_1, window_bounds = array<i64: 16, 128>}, {transform_indices = @transform_2, window_bounds = array<i64: 16, 128>}]} {
    %c0 = arith.constant 0 : index
    %c0_0 = arith.constant 0 : index
    %0 = vector.load %arg2[%c0, %c0_0] : memref<16x128xf32, #tpu.memory_space<vmem>>, vector<16x128xf32>
    %c0_1 = arith.constant 0 : index
    %1 = memref.load %arg1[%c0_1] : memref<8xf32, #tpu.memory_space<smem>>
    %2 = vector.broadcast %1 : f32 to vector<16x128xf32>
    %3 = arith.mulf %0, %2 : vector<16x128xf32>
    %c1 = arith.constant 1 : index
    %4 = memref.load %arg1[%c1] : memref<8xf32, #tpu.memory_space<smem>>
    %5 = vector.broadcast %4 : f32 to vector<16x128xf32>
    %6 = arith.addf %3, %5 : vector<16x128xf32>
    %7 = math.tanh %6 : vector<16x128xf32>
    %c2 = arith.constant 2 : index
    %8 = memref.load %arg1[%c2] : memref<8xf32, #tpu.memory_space<smem>>
    %9 = vector.broadcast %8 : f32 to vector<16x128xf32>
    %10 = arith.mulf %7, %9 : vector<16x128xf32>
    %c3 = arith.constant 3 : index
    %11 = memref.load %arg1[%c3] : memref<8xf32, #tpu.memory_space<smem>>
    %12 = vector.broadcast %11 : f32 to vector<16x128xf32>
    %13 = arith.addf %10, %12 : vector<16x128xf32>
    %14 = math.tanh %13 : vector<16x128xf32>
    %c4 = arith.constant 4 : index
    %15 = memref.load %arg1[%c4] : memref<8xf32, #tpu.memory_space<smem>>
    %16 = vector.broadcast %15 : f32 to vector<16x128xf32>
    %17 = arith.mulf %14, %16 : vector<16x128xf32>
    %c5 = arith.constant 5 : index
    %18 = memref.load %arg1[%c5] : memref<8xf32, #tpu.memory_space<smem>>
    %19 = vector.broadcast %18 : f32 to vector<16x128xf32>
    %20 = arith.addf %17, %19 : vector<16x128xf32>
    %21 = math.tanh %20 : vector<16x128xf32>
    %c6 = arith.constant 6 : index
    %22 = memref.load %arg1[%c6] : memref<8xf32, #tpu.memory_space<smem>>
    %23 = vector.broadcast %22 : f32 to vector<16x128xf32>
    %24 = arith.mulf %21, %23 : vector<16x128xf32>
    %c7 = arith.constant 7 : index
    %25 = memref.load %arg1[%c7] : memref<8xf32, #tpu.memory_space<smem>>
    %26 = vector.broadcast %25 : f32 to vector<16x128xf32>
    %27 = arith.addf %24, %26 : vector<16x128xf32>
    %28 = math.tanh %27 : vector<16x128xf32>
    %c0_2 = arith.constant 0 : index
    %c0_3 = arith.constant 0 : index
    %29 = vector.load %arg3[%c0_2, %c0_3] : memref<16x128xf32, #tpu.memory_space<vmem>>, vector<16x128xf32>
    tpu.vector_store %arg3[%c0_2, %c0_3], %28 {strides = array<i32>} : memref<16x128xf32, #tpu.memory_space<vmem>>, vector<16x128xf32>,
    return
  }
  func.func @transform_0(%arg0: i32) -> i32 {
    %c0_i32 = arith.constant 0 : i32
    %c0_i32_0 = arith.constant 0 : i32
    return %c0_i32 : i32
  }
  func.func @transform_1(%arg0: i32) -> (i32, i32) {
    %c0_i32 = arith.constant 0 : i32
    %c0_i32_0 = arith.constant 0 : i32
    return %arg0, %c0_i32 : i32, i32
  }
  func.func @transform_2(%arg0: i32) -> (i32, i32) {
    %c0_i32 = arith.constant 0 : i32
    %c0_i32_0 = arith.constant 0 : i32
    return %arg0, %c0_i32 : i32, i32
  }
}

</mosaic_0001>

<bundles_post_ra>
// kernel: tpu_custom_call.1
= control target key start
LH: loop header
LB: loop body
LE: loop exit
PB: predicated region body
PF: predicated region fallthrough
CT: control target
= control target key end

     0   :  { %7 = vsyncpa [#allocation5], 0  ;;  %s752_s0 = inlined_call_operand.hbm [shape: f32[8], index: 0, kind: input, shape index: {}]   ;;  %s753_s1 = inlined_call_operand.hbm [shape: f32[32,128], index: 1, kind: input, shape index: {}]   ;;  %s754_s2 = inlined_call_operand.hbm [shape: f32[32,128], index: 2, kind: output, shape index: {}]  }
   0x1   :  { %8 = vsyncpa [#allocation3], 0 }
   0x2   :  { %10 = vsyncpa [#allocation3 + $0x1], 0 }
   0x3   :  { %11 = vsyncpa [#allocation4], 0 }
   0x4   :  { %13 = vsyncpa [#allocation4 + $0x1], 0  ;;  %s558_s9 = smov 0   ;;  %s560_s10 = smov 0  }
   0x5   :  { %s562_s11 = smov 0   ;;  %s564_s12 = smov 0  }
   0x6 LB: > { %s579_s13 = sadd.s32 4294967295, %s534_s12   ;;  %s319_s14 = sadd.s32 4294967294, %s534_s12   ;;  %s534_s12 = sphi %s564_s12, %s774_s12   ;;  %s530_s11 = sphi %s562_s11, %s773_s11   ;;  %s526_s10 = sphi %s560_s10, %s772_s10   ;;  %s522_s9 = sphi %s558_s9, %s771_s9  }
   0x7   : > { %s583_s15 = sadd.s32 1, %s534_s12   ;;  %s47_s16 = sadd.s32 1, %s530_s11 }
   0x8   : > { %s44_s17 = ssub.s32 %s534_s12, %s583_s15  ;;  %p54_p0 = scmp.ne.s32.totalorder %s530_s11, %s526_s10 }
   0x9   : > { %p45_p1 = scmp.eq.s32.totalorder %s44_s17, 0  ;;  %p55_p2 = scmp.eq.s32.totalorder %s534_s12, 0 }
   0xa   : > { %p60_p3 = scmp.ne.s32.totalorder %s526_s10, %s522_s9  ;;  %p755_p4 = scmp.eq.s32.totalorder %s579_s13, 0 }
   0xb   : > { %s595_s18 = scalar_select %p45_p1, %s530_s11, %s47_s16  }
   0xc   : > { %p597_p5 = por %p55_p2, %p54_p0  ;;  %p603_p6 = por %p755_p4, %p60_p3 }
   0xd   : > { %p84_p7 = scmp.eq.s32.totalorder %s579_s13, 1  ;;  %p90_p8 = scmp.eq.s32.totalorder %s319_s14, 1 }
   0xe   : > { %s759_s20 = scalar_select %p603_p6, 1, 0 }
   0xf   : > { %p320_p9 = scmp.ge.s32.totalorder %s534_s12, 1  ;;  %p97_p10 = scmp.lt.s32.totalorder %s534_s12, 3 }
  0x10   : > { %p610_p11 = por %p84_p7, %p54_p0  ;;  %p614_p12 = por %p90_p8, %p60_p3 }
  0x11   : > { %p618_p13 = pnand %p320_p9, %p97_p10  ;;  %p365_p4 = scmp.lt.s32.totalorder %s534_s12, 2 }
  0x12   : > { %s760_s21 = scalar_select %p610_p11, 1, 0 }
  0x13   : > { %s761_s22 = scalar_select %p614_p12, 1, 0 }
  0x14   : > { %p352_p2 = pneg %p618_p13  ;;  %s119_s24 = sand.u32 1, %s530_s11  }
  0x15   : > { %s342_s25 = sshll.u32 %s534_s12, 8  ;;  %p763_p6 = scmp.eq.s32.totalorder %s579_s13, 0 }
  0x16   : > { %p632_p7 = pnand %p365_p4, %p597_p5  ;;  %s323_s27 = sshll.u32 %s119_s24, 4 }
  0x17   : > { %p353_p0 = pnand %p352_p2, %p763_p6  ;;  %s421_s30 = scalar_lea.hbm %s752_s0, 16 }
  0x18   : > { %p422_p3 = scmp.ne.s32.totalorder %s752_s0, %s421_s30  ;;  %p428_p6 = scmp.lt.u32.totalorder %s421_s30, %s752_s0 }
  0x19   : > { %p423_p8 = pneg %p353_p0 }
  0x1b   : > { %p424_p9 = pnand %p423_p8, %p422_p3 }
  0x1d   : > { %p425_p10 = pneg %p424_p9 }
  0x1f   : > { %p430_p4 = pnand %p428_p6, %p425_p10 }
  0x21   : > { %433 = shalt.err (!%p430_p4)
}
  0x22   : > { %s536_s7 = smov [#allocation2]   ;;  %s651_s19 = scalar_lea.hbm %s753_s1, %s342_s25 }
  0x23   : > { %355 = dma.hbm_to_smem (!%p353_p0), %s752_s0, 16, %s536_s7, [#allocation5]  }
  0x24   : > { %s123_s28 = scalar_lea.vmem [#allocation6], %s323_s27  ;;  %s655_s30 = scalar_lea.sflag [#allocation3], %s119_s24 }
  0x25   : > { %s130_s29 = sshll.u32 %s123_s28, 4  ;;  %s434_s3 = scalar_lea.hbm %s651_s19, 256  ;;  %s653_s29 = int_to_ptr.vmem [resolvable:$true] %s130_s29 }
  0x26   : > { %p435_p5 = scmp.ne.s32.totalorder %s651_s19, %s434_s3  ;;  %p436_p2 = pneg %p632_p7 }
  0x27   : > { %s439_s5 = scalar_lea.hbm %s753_s1, 512  ;;  %p440_p8 = scmp.lt.u32.totalorder %s651_s19, %s753_s1 }
  0x28   : > { %p437_p0 = pnand %p436_p2, %p435_p5  ;;  %p441_p9 = scmp.lt.u32.totalorder %s439_s5, %s434_s3 }
  0x29   : > { %p443_p6 = scmp.lt.u32.totalorder %s434_s3, %s651_s19 }
  0x2a   : > { %p438_p3 = pneg %p437_p0  ;;  %p442_p10 = por %p441_p9, %p440_p8 }
  0x2c   : > { %p444_p4 = por %p443_p6, %p442_p10 }
  0x2e   : > { %p445_p1 = pnand %p444_p4, %p438_p3 }
  0x30   : > { %448 = shalt.err (!%p445_p1)
}
  0x31   : > { %s449_s24 = scalar_lea.vmem %s653_s29, 256  ;;  %s537_s27 = smov [#allocation6]  }
  0x32   : > { %p450_p5 = scmp.ne.s32.totalorder %s653_s29, %s449_s24  ;;  %s454_s8 = sshll.u32 %s537_s27, 4  ;;  %s455_s8 = int_to_ptr.vmem [resolvable:$false] %s454_s8 }
  0x33   : > { %s456_s14 = scalar_lea.vmem %s455_s8, 512  ;;  %p457_p11 = scmp.lt.s32.totalorder %s653_s29, %s455_s8 }
  0x34   : > { %p452_p0 = pnand %p450_p5, %p436_p2  ;;  %p458_p8 = scmp.lt.s32.totalorder %s456_s14, %s449_s24 }
  0x36   : > { %p453_p12 = pneg %p452_p0  ;;  %p459_p9 = por %p458_p8, %p457_p11 }
  0x38   : > { %p460_p10 = pnand %p459_p9, %p453_p12 }
  0x3a   : > { %463 = shalt.err (!%p460_p10)
}
  0x3b   : > { %s538_s16 = smov 128   ;;  %s539_s17 = smov 8  }
  0x3c   : > { %359 = dma.hbm_to_vmem [thread:$0]  (!%p632_p7), %s651_s19, 256, %s653_s29, %s655_s30, %s538_s16, %s538_s16, %s539_s17  }
  0x3d   : > { %142 = sbr.rel (%p618_p13) target bundleno = 158 (0x9e), region = 28  ;;  %p765_p1 = scmp.eq.s32.totalorder (!%p618_p13), %s579_s13, 0 }
  0x44   : > { %509 = dma.done.wait (%p765_p1), [#allocation5], 16   ;;  %p766_p2 = pmov %p765_p1 }
  0x45   : > { %s690_s28 = sand.u32 1, %s526_s10   ;;  %p767_p11 = scmp.ne.s32.totalorder %s759_s20, 0 }
  0x46   : > { %511 = vsyncadd (%p766_p2), [#allocation5], 4294967280  ;;  %s328_s3 = sshll.u32 %s690_s28, 4  ;;  %s149_s25 = scalar_lea.sflag [#allocation3], %s690_s28 }
  0x47   : > { %s152_s26 = scalar_lea.vmem [#allocation6], %s328_s3 }
  0x48   : > { %513 = dma.done.wait (%p767_p11), %s149_s25, 256  }
  0x49   : > { %515 = vsyncadd (%p767_p11), %s149_s25, 4294967040 }
  0x4a   : > { %157 = sfence }
  0x4b   : > { %s178_s23 = sld [smem:[#allocation2]]  ;;  %s330_s19 = sld [smem:[#allocation2 + $0x1]]  ;;  %v176_v0 = vld [vmem:[%s152_s26] sm:$0xff]  ;;  %v177_v1 = vld [vmem:[%s152_s26 + $0x8] sm:$0xff] }
  0x4c   : > { %s331_s29 = sld [smem:[#allocation2 + $0x2]]  ;;  %s332_s30 = sld [smem:[#allocation2 + $0x3]] }
  0x4d   : > { %s333_s20 = sld [smem:[#allocation2 + $0x4]]  ;;  %s334_s4 = sld [smem:[#allocation2 + $0x5]] }
  0x4e   : > { %s335_s5 = sld [smem:[#allocation2 + $0x6]]  ;;  %s336_s6 = sld [smem:[#allocation2 + $0x7]] }
  0x4f   : > { %s173_s7 = scalar_lea.vmem [#allocation7], %s328_s3  ;;  %s343_s27 = sshll.u32 %s579_s13, 8 }
  0x50   : > { %s234_s24 = sshll.u32 %s173_s7, 4  ;;  %s708_s16 = scalar_lea.hbm %s754_s2, %s343_s27  ;;  %s703_s24 = int_to_ptr.vmem [resolvable:$true] %s234_s24 }
  0x51   : > { %v179_v2 = vstv %s178_s23  ;;  %v183_v4 = vstv %s330_s19  ;;  %s221_s17 = scalar_lea.sflag [#allocation4], %s690_s28  ;;  %s464_s25 = scalar_lea.vmem %s703_s24, 256 }
  0x52   : > { %v180_v3 = vmul.f32 %v179_v2, %v176_v0  ;;  %v181_v5 = vmul.f32 %v179_v2, %v177_v1  ;;  %v189_v8 = vstv %s331_s29  ;;  %v193_v10 = vstv %s332_s30  ;;  %p465_p12 = scmp.ne.s32.totalorder %s703_s24, %s464_s25  ;;  %p768_p13 = scmp.ne.s32.totalorder %s760_s21, 0 }
  0x53   : > { %v199_v16 = vstv %s333_s20  ;;  %v203_v18 = vstv %s334_s4  ;;  %s540_s13 = smov [#allocation7]  }
  0x54   : > { %v184_v6 = vadd.f32 %v183_v4, %v180_v3  ;;  %v185_v7 = vadd.f32 %v183_v4, %v181_v5  ;;  %v209_v24 = vstv %s335_s5  ;;  %v213_v26 = vstv %s336_s6  ;;  %p466_p7 = pnand %p465_p12, %p768_p13  ;;  %s468_s3 = sshll.u32 %s540_s13, 4  ;;  %s469_s3 = int_to_ptr.vmem [resolvable:$false] %s468_s3 }
  0x55   : > { %s470_s26 = scalar_lea.vmem %s469_s3, 512  ;;  %p471_p6 = scmp.lt.s32.totalorder %s703_s24, %s469_s3 }
  0x56   : > { %405 = vtanh.f32 %v184_v6  ;;  %p467_p3 = pneg %p466_p7  ;;  %p472_p4 = scmp.lt.s32.totalorder %s470_s26, %s464_s25 }
  0x57   : > { %407 = vtanh.f32 %v185_v7 }
  0x58   : > { %p473_p5 = por %p472_p4, %p471_p6 }
  0x5a   : > { %p474_p0 = pnand %p473_p5, %p467_p3 }
  0x60   : > { %v406_v9 = vpop.eup %405 }
  0x61   : > { %v408_v11 = vpop.eup %407  ;;  %v190_v12 = vmul.f32 %v406_v9, %v189_v8 }
  0x62   : > { %v191_v13 = vmul.f32 %v408_v11, %v189_v8 }
  0x63   : > { %v194_v14 = vadd.f32 %v193_v10, %v190_v12 }
  0x64   : > { %v195_v15 = vadd.f32 %v193_v10, %v191_v13 }
  0x65   : > { %409 = vtanh.f32 %v194_v14 }
  0x66   : > { %411 = vtanh.f32 %v195_v15 }
  0x6f   : > { %v410_v17 = vpop.eup %409 }
  0x70   : > { %v412_v19 = vpop.eup %411  ;;  %v200_v20 = vmul.f32 %v410_v17, %v199_v16 }
  0x71   : > { %v201_v21 = vmul.f32 %v412_v19, %v199_v16 }
  0x72   : > { %v204_v22 = vadd.f32 %v203_v18, %v200_v20 }
  0x73   : > { %v205_v23 = vadd.f32 %v203_v18, %v201_v21 }
  0x74   : > { %413 = vtanh.f32 %v204_v22 }
  0x75   : > { %415 = vtanh.f32 %v205_v23 }
  0x7e   : > { %v414_v25 = vpop.eup %413 }
  0x7f   : > { %v416_v27 = vpop.eup %415  ;;  %v210_v28 = vmul.f32 %v414_v25, %v209_v24 }
  0x80   : > { %v211_v29 = vmul.f32 %v416_v27, %v209_v24 }
  0x81   : > { %v214_v30 = vadd.f32 %v213_v26, %v210_v28 }
  0x82   : > { %v215_v31 = vadd.f32 %v213_v26, %v211_v29 }
  0x83   : > { %417 = vtanh.f32 %v214_v30 }
  0x84   : > { %419 = vtanh.f32 %v215_v31 }
  0x8d   : > { %v418_v32 = vpop.eup %417 }
  0x8e   : > { %v420_v33 = vpop.eup %419  ;;  %218 = vst [vmem:[%s173_s7] sm:$0xff] %v418_v32 }
  0x8f   : > { %219 = vst [vmem:[%s173_s7 + $0x8] sm:$0xff] %v420_v33 }
  0x90   : > { %477 = shalt.err (!%p474_p0)
}
  0x91   : > { %s478_s23 = scalar_lea.hbm %s708_s16, 256  ;;  %s482_s30 = scalar_lea.hbm %s754_s2, 512 }
  0x92   : > { %p479_p8 = scmp.ne.s32.totalorder %s708_s16, %s478_s23  ;;  %p483_p1 = scmp.lt.u32.totalorder %s708_s16, %s754_s2 }
  0x93   : > { %p484_p2 = scmp.lt.u32.totalorder %s482_s30, %s478_s23  ;;  %p486_p12 = scmp.lt.u32.totalorder %s478_s23, %s708_s16 }
  0x94   : > { %p480_p9 = pnand %p479_p8, %p768_p13 }
  0x95   : > { %p485_p11 = por %p484_p2, %p483_p1 }
  0x96   : > { %p481_p10 = pneg %p480_p9 }
  0x97   : > { %p487_p7 = por %p486_p12, %p485_p11 }
  0x99   : > { %p488_p3 = pnand %p487_p7, %p481_p10 }
  0x9b   : > { %491 = shalt.err (!%p488_p3)
}
  0x9c   : > { %s541_s5 = smov 128   ;;  %s542_s6 = smov 8  }
  0x9d   : > { %350 = dma.vmem_to_hbm [thread:$0]  (%p768_p13), %s703_s24, 256, %s708_s16, %s221_s17, %s541_s5, %s541_s5, %s542_s6  }
  0x9e PF: > { %s249_s7 = sand.u32 1, %s522_s9   ;;  %p769_p6 = scmp.ne.s32.totalorder %s761_s22, 0 }
  0x9f   : > { %p770_p4 = scmp.ge.s32.totalorder %s534_s12, 2  ;;  %s250_s27 = scalar_lea.sflag [#allocation4], %s249_s7 }
  0xa1   : > { %p361_p5 = pnand %p770_p4, %p769_p6 }
  0xa3   : > { %517 = dma.done.wait (!%p361_p5), %s250_s27, 256  }
  0xa4   : > { %519 = vsyncadd (!%p361_p5), %s250_s27, 4294967040  ;;  %p16_p0 = scmp.ge.s32.totalorder %s583_s15, 4   ;;  %s771_s9 = smov %s526_s10 }
  0xa5   : > { %s772_s10 = smov %s530_s11  ;;  %s773_s11 = smov %s595_s18 }
  0xa6   : > { %s774_s12 = smov %s583_s15  ;;  %18 = sbr.rel (!%p16_p0) target bundleno = 6 (0x6), region = 78 }
  0xad   :  { %255 = vsyncpa [#allocation3], 1 }
  0xae   :  { %257 = vsyncpa [#allocation3 + $0x1], 1 }
  0xaf   :  { %258 = vsyncpa [#allocation4], 1 }
  0xb0   :  { %260 = vsyncpa [#allocation4 + $0x1], 1 }
  0xb1   :  { %261 = vsyncpa [#allocation5], 1 }
  0xb2   :  { %263 = vsyncpa [#allocation5 + $0x1], 1 }

</bundles_post_ra>
